<compile_context>
chip_gen: v5e
topology: v5e:2x2
jax: 0.10.0
libtpu: 0.0.40
codegen_flags: <defaults>
</compile_context>

<pallas_src>
import jax
import jax.numpy as jnp
from jax.experimental import pallas as pl
from jax.experimental.pallas import tpu as pltpu

LANE = 128
SUBLANE_BF16 = 16


def _round_up(v, m):
    return ((v + m - 1) // m) * m


def _feat_pad(d):
    # Lane / N dims: 128 floor for tiny dims, 256-aligned above that to fill
    # the 2x256x256 MXU on v6e/v7x (128 is already optimal on v5e).
    return 128 if d <= 128 else _round_up(d, 256)


def mlp_relu_kernel(x_ref, w1_ref, b1_ref, w2_ref, b2_ref, w3_ref, b3_ref, o_ref):
    # Layer 1: Linear + ReLU (bf16 operands feed the MXU, f32 accumulation).
    h1 = jnp.dot(x_ref[...], w1_ref[...], preferred_element_type=jnp.float32)
    h1 = jnp.maximum(h1 + b1_ref[...], 0.0)
    # Layer 2: Linear + ReLU.
    h2 = jnp.dot(h1.astype(jnp.bfloat16), w2_ref[...],
                 preferred_element_type=jnp.float32)
    h2 = jnp.maximum(h2 + b2_ref[...], 0.0)
    # Layer 3: Linear (no activation).
    out = jnp.dot(h2.astype(jnp.bfloat16), w3_ref[...],
                  preferred_element_type=jnp.float32)
    o_ref[...] = (out + b3_ref[...]).astype(o_ref.dtype)


def _pad2(a, rows, cols, dtype):
    return (jnp.zeros((rows, cols), dtype)
            .at[: a.shape[0], : a.shape[1]].set(a.astype(dtype)))


def pad_params(w1, b1, w2, b2, w3, b3):
    """Pad / cast parameters ONCE, outside the forward hot path.

    Weights are stored [in, out]; biases are [1, out].  Zero-padded weight
    rows/cols and zero biases stay zero through ReLU, so the math is unchanged.
    """
    D_in, H1 = w1.shape
    H2 = w2.shape[1]
    D_out = w3.shape[1]

    D_in_p = _round_up(D_in, SUBLANE_BF16)   # contraction dim: minimal padding
    H1_p = _feat_pad(H1)
    H2_p = _feat_pad(H2)
    D_out_p = _feat_pad(D_out)

    return dict(
        w1=_pad2(w1, D_in_p, H1_p, jnp.bfloat16),
        b1=_pad2(b1, 1, H1_p, jnp.float32),
        w2=_pad2(w2, H1_p, H2_p, jnp.bfloat16),
        b2=_pad2(b2, 1, H2_p, jnp.float32),
        w3=_pad2(w3, H2_p, D_out_p, jnp.bfloat16),
        b3=_pad2(b3, 1, D_out_p, jnp.float32),
        dims=(D_in, H1, H2, D_out),
        padded=(D_in_p, H1_p, H2_p, D_out_p),
    )


def net_relu_forward(x, params, *, block_b=256, out_dtype=jnp.float32):
    """NetRelu forward on pre-padded params (see pad_params)."""
    B, D_in = x.shape
    D_in_chk, H1, H2, D_out = params["dims"]
    assert D_in == D_in_chk, "x feature dim does not match params"
    D_in_p, H1_p, H2_p, D_out_p = params["padded"]

    # Batch tile: multiple of 16 (bf16 sublane packing), capped at block_b.
    TB = _round_up(min(block_b, _round_up(B, SUBLANE_BF16)), SUBLANE_BF16)
    # v7x has 2 TensorCores: keep the parallel batch grid >= 2 steps when the
    # batch allows it, so the second core is never idle.
    if B >= 2 * SUBLANE_BF16 and _round_up(B, TB) // TB < 2:
        TB = _round_up(pl.cdiv(B, 2), SUBLANE_BF16)
    B_p = _round_up(B, TB)
    grid = (B_p // TB,)

    # Only x is padded/cast in the hot path.
    x_p = _pad2(x, B_p, D_in_p, jnp.bfloat16)

    # Weights/biases: constant index_map -> VMEM-resident across batch tiles.
    # Buffered(1): no point double-buffering a block that never changes.
    def resident(r, c):
        return pl.BlockSpec((r, c), lambda i: (0, 0),
                            pipeline_mode=pl.Buffered(1))

    # Explicit VMEM budget: 2x-buffered x/out tiles, 1x-buffered resident
    # weights/biases, f32 intermediates, plus generous headroom.
    out_bytes = jnp.dtype(out_dtype).itemsize
    bytes_x = 2 * TB * D_in_p * 2
    bytes_o = 2 * TB * D_out_p * out_bytes
    bytes_w = (D_in_p * H1_p + H1_p * H2_p + H2_p * D_out_p) * 2
    bytes_b = (H1_p + H2_p + D_out_p) * 4
    bytes_h = TB * (H1_p + H2_p) * 4
    vmem_bytes = int(1.5 * (bytes_x + bytes_o + bytes_w + bytes_b + bytes_h)) + (4 << 20)
    vmem_bytes = min(vmem_bytes, 64 << 20)   # never above v7x physical VMEM

    flops = 2 * B_p * (D_in_p * H1_p + H1_p * H2_p + H2_p * D_out_p)
    bytes_accessed = (B_p * D_in_p * 2 + bytes_w + bytes_b
                      + B_p * D_out_p * out_bytes)

    out_p = pl.pallas_call(
        mlp_relu_kernel,
        out_shape=jax.ShapeDtypeStruct((B_p, D_out_p), out_dtype),
        grid=grid,
        in_specs=[
            pl.BlockSpec((TB, D_in_p), lambda i: (i, 0)),  # x: one batch tile / step
            resident(D_in_p, H1_p),
            resident(1, H1_p),
            resident(H1_p, H2_p),
            resident(1, H2_p),
            resident(H2_p, D_out_p),
            resident(1, D_out_p),
        ],
        out_specs=pl.BlockSpec((TB, D_out_p), lambda i: (i, 0)),
        compiler_params=pltpu.CompilerParams(
            dimension_semantics=("parallel",),
            vmem_limit_bytes=vmem_bytes),
        cost_estimate=pl.CostEstimate(
            flops=flops, transcendentals=0, bytes_accessed=bytes_accessed),
    )(x_p, params["w1"], params["b1"], params["w2"], params["b2"],
      params["w3"], params["b3"])

    # Slice away batch / lane padding.
    return out_p[:B, :D_out]


def init_linear(key, fan_in, fan_out):
    """Deterministic init mirroring nn.Linear's U(-1/sqrt(fan_in), 1/sqrt(fan_in))."""
    kw, kb = jax.random.split(key)
    bound = 1.0 / jnp.sqrt(float(fan_in))
    # stored as [in, out] (transposed vs PyTorch's [out, in])
    w = jax.random.uniform(kw, (fan_in, fan_out), jnp.float32, -bound, bound)
    b = jax.random.uniform(kb, (1, fan_out), jnp.float32, -bound, bound)
    return w, b


if __name__ == "__main__":
    # Small shapes consistent with the MLP (MNIST-style D_in scaled down).
    B, D_in, H1, H2, D_out = 32, 64, 32, 32, 10

    key = jax.random.PRNGKey(0)
    kx, k1, k2, k3 = jax.random.split(key, 4)

    x = jax.random.normal(kx, (B, D_in), jnp.float32)
    w1, b1 = init_linear(k1, D_in, H1)
    w2, b2 = init_linear(k2, H1, H2)
    w3, b3 = init_linear(k3, H2, D_out)

    # Pad/cast weights once (outside the hot path).
    params = pad_params(w1, b1, w2, b2, w3, b3)

    # B=32 forces TB=16 -> grid=(2,), exercising the batch-parallel grid.
    out = net_relu_forward(x, params)
    jax.block_until_ready(out)

    # Reference in plain JAX (f32). The kernel uses bf16 MXU operands with f32
    # accumulation, so compare with a correspondingly loosened tolerance.
    ref = jnp.maximum(x @ w1 + b1, 0.0)
    ref = jnp.maximum(ref @ w2 + b2, 0.0)
    ref = ref @ w3 + b3

    assert out.shape == (B, D_out)
    assert jnp.allclose(out, ref, atol=3e-2, rtol=3e-2), float(
        jnp.max(jnp.abs(out - ref)))

    print("KERNEL_OK")
</pallas_src>

<mosaic_0001>
module attributes {stable_mosaic.version = 11 : i64} {
  func.func @mlp_relu_kernel(%arg0: i32, %arg1: memref<16x64xbf16, #tpu.memory_space<vmem>>, %arg2: memref<64x128xbf16, #tpu.memory_space<vmem>>, %arg3: memref<1x128xf32, #tpu.memory_space<vmem>>, %arg4: memref<128x128xbf16, #tpu.memory_space<vmem>>, %arg5: memref<1x128xf32, #tpu.memory_space<vmem>>, %arg6: memref<128x128xbf16, #tpu.memory_space<vmem>>, %arg7: memref<1x128xf32, #tpu.memory_space<vmem>>, %arg8: memref<16x128xf32, #tpu.memory_space<vmem>>) attributes {dimension_semantics = [#tpu.dimension_semantics<parallel>], iteration_bounds = array<i64: 2>, scalar_prefetch = 0 : i64, scratch_operands = 0 : i64, tpu.core_type = #tpu.core_type<tc>, window_params = [{transform_indices = @transform_0, window_bounds = array<i64: 16, 64>}, {pipeline_mode = #tpu.pipeline_mode<synchronous>, transform_indices = @transform_1, window_bounds = array<i64: 64, 128>}, {pipeline_mode = #tpu.pipeline_mode<synchronous>, transform_indices = @transform_2, window_bounds = array<i64: 1, 128>}, {pipeline_mode = #tpu.pipeline_mode<synchronous>, transform_indices = @transform_3, window_bounds = array<i64: 128, 128>}, {pipeline_mode = #tpu.pipeline_mode<synchronous>, transform_indices = @transform_4, window_bounds = array<i64: 1, 128>}, {pipeline_mode = #tpu.pipeline_mode<synchronous>, transform_indices = @transform_5, window_bounds = array<i64: 128, 128>}, {pipeline_mode = #tpu.pipeline_mode<synchronous>, transform_indices = @transform_6, window_bounds = array<i64: 1, 128>}, {transform_indices = @transform_7, window_bounds = array<i64: 16, 128>}]} {
    %c0 = arith.constant 0 : index
    %c0_0 = arith.constant 0 : index
    %0 = vector.load %arg1[%c0, %c0_0] : memref<16x64xbf16, #tpu.memory_space<vmem>>, vector<16x64xbf16>
    %c0_1 = arith.constant 0 : index
    %c0_2 = arith.constant 0 : index
    %1 = vector.load %arg2[%c0_1, %c0_2] : memref<64x128xbf16, #tpu.memory_space<vmem>>, vector<64x128xbf16>
    %cst = arith.constant dense<0.000000e+00> : vector<16x128xf32>
    %2 = tpu.matmul %0, %1, %cst {dimension_numbers = #tpu.dot_dimension_numbers<[1], [0], [0], [1], [0, 0, 1, 1], [], []>} : vector<16x64xbf16>, vector<64x128xbf16>, vector<16x128xf32> -> vector<16x128xf32>
    %c0_3 = arith.constant 0 : index
    %c0_4 = arith.constant 0 : index
    %3 = vector.load %arg3[%c0_3, %c0_4] : memref<1x128xf32, #tpu.memory_space<vmem>>, vector<1x128xf32>
    %4 = vector.broadcast %3 : vector<1x128xf32> to vector<16x128xf32>
    %5 = arith.addf %2, %4 : vector<16x128xf32>
    %cst_5 = arith.constant 0.000000e+00 : f32
    %6 = vector.broadcast %cst_5 : f32 to vector<16x128xf32>
    %7 = arith.maximumf %5, %6 : vector<16x128xf32>
    %8 = arith.truncf %7 : vector<16x128xf32> to vector<16x128xbf16>
    %c0_6 = arith.constant 0 : index
    %c0_7 = arith.constant 0 : index
    %9 = vector.load %arg4[%c0_6, %c0_7] : memref<128x128xbf16, #tpu.memory_space<vmem>>, vector<128x128xbf16>
    %cst_8 = arith.constant dense<0.000000e+00> : vector<16x128xf32>
    %10 = tpu.matmul %8, %9, %cst_8 {dimension_numbers = #tpu.dot_dimension_numbers<[1], [0], [0], [1], [0, 0, 1, 1], [], []>} : vector<16x128xbf16>, vector<128x128xbf16>, vector<16x128xf32> -> vector<16x128xf32>
    %c0_9 = arith.constant 0 : index
    %c0_10 = arith.constant 0 : index
    %11 = vector.load %arg5[%c0_9, %c0_10] : memref<1x128xf32, #tpu.memory_space<vmem>>, vector<1x128xf32>
    %12 = vector.broadcast %11 : vector<1x128xf32> to vector<16x128xf32>
    %13 = arith.addf %10, %12 : vector<16x128xf32>
    %cst_11 = arith.constant 0.000000e+00 : f32
    %14 = vector.broadcast %cst_11 : f32 to vector<16x128xf32>
    %15 = arith.maximumf %13, %14 : vector<16x128xf32>
    %16 = arith.truncf %15 : vector<16x128xf32> to vector<16x128xbf16>
    %c0_12 = arith.constant 0 : index
    %c0_13 = arith.constant 0 : index
    %17 = vector.load %arg6[%c0_12, %c0_13] : memref<128x128xbf16, #tpu.memory_space<vmem>>, vector<128x128xbf16>
    %cst_14 = arith.constant dense<0.000000e+00> : vector<16x128xf32>
    %18 = tpu.matmul %16, %17, %cst_14 {dimension_numbers = #tpu.dot_dimension_numbers<[1], [0], [0], [1], [0, 0, 1, 1], [], []>} : vector<16x128xbf16>, vector<128x128xbf16>, vector<16x128xf32> -> vector<16x128xf32>
    %c0_15 = arith.constant 0 : index
    %c0_16 = arith.constant 0 : index
    %19 = vector.load %arg7[%c0_15, %c0_16] : memref<1x128xf32, #tpu.memory_space<vmem>>, vector<1x128xf32>
    %20 = vector.broadcast %19 : vector<1x128xf32> to vector<16x128xf32>
    %21 = arith.addf %18, %20 : vector<16x128xf32>
    %c0_17 = arith.constant 0 : index
    %c0_18 = arith.constant 0 : index
    %22 = vector.load %arg8[%c0_17, %c0_18] : memref<16x128xf32, #tpu.memory_space<vmem>>, vector<16x128xf32>
    tpu.vector_store %arg8[%c0_17, %c0_18], %21 {strides = array<i32>} : memref<16x128xf32, #tpu.memory_space<vmem>>, vector<16x128xf32>,
    return
  }
  func.func @transform_0(%arg0: i32) -> (i32, i32) {
    %c0_i32 = arith.constant 0 : i32
    %c0_i32_0 = arith.constant 0 : i32
    return %arg0, %c0_i32 : i32, i32
  }
  func.func @transform_1(%arg0: i32) -> (i32, i32) {
    %c0_i32 = arith.constant 0 : i32
    %c0_i32_0 = arith.constant 0 : i32
    %c0_i32_1 = arith.constant 0 : i32
    return %c0_i32, %c0_i32_0 : i32, i32
  }
  func.func @transform_2(%arg0: i32) -> (i32, i32) {
    %c0_i32 = arith.constant 0 : i32
    %c0_i32_0 = arith.constant 0 : i32
    %c0_i32_1 = arith.constant 0 : i32
    return %c0_i32, %c0_i32_0 : i32, i32
  }
  func.func @transform_3(%arg0: i32) -> (i32, i32) {
    %c0_i32 = arith.constant 0 : i32
    %c0_i32_0 = arith.constant 0 : i32
    %c0_i32_1 = arith.constant 0 : i32
    return %c0_i32, %c0_i32_0 : i32, i32
  }
  func.func @transform_4(%arg0: i32) -> (i32, i32) {
    %c0_i32 = arith.constant 0 : i32
    %c0_i32_0 = arith.constant 0 : i32
    %c0_i32_1 = arith.constant 0 : i32
    return %c0_i32, %c0_i32_0 : i32, i32
  }
  func.func @transform_5(%arg0: i32) -> (i32, i32) {
    %c0_i32 = arith.constant 0 : i32
    %c0_i32_0 = arith.constant 0 : i32
    %c0_i32_1 = arith.constant 0 : i32
    return %c0_i32, %c0_i32_0 : i32, i32
  }
  func.func @transform_6(%arg0: i32) -> (i32, i32) {
    %c0_i32 = arith.constant 0 : i32
    %c0_i32_0 = arith.constant 0 : i32
    %c0_i32_1 = arith.constant 0 : i32
    return %c0_i32, %c0_i32_0 : i32, i32
  }
  func.func @transform_7(%arg0: i32) -> (i32, i32) {
    %c0_i32 = arith.constant 0 : i32
    %c0_i32_0 = arith.constant 0 : i32
    return %arg0, %c0_i32 : i32, i32
  }
}

</mosaic_0001>

<bundles_post_ra>
// kernel: tpu_custom_call.1
= control target key start
LH: loop header
LB: loop body
LE: loop exit
PB: predicated region body
PF: predicated region fallthrough
CT: control target
= control target key end

     0   :  { %s1338_s0 = inlined_call_operand.hbm [shape: bf16[32,64], index: 0, kind: input, shape index: {}]   ;;  %s1339_s1 = inlined_call_operand.hbm [shape: bf16[64,128], index: 1, kind: input, shape index: {}]   ;;  %s1340_s2 = inlined_call_operand.vmem [shape: f32[1,128], index: 2, kind: input, shape index: {}]   ;;  %s1341_s3 = inlined_call_operand.hbm [shape: bf16[128,128], index: 3, kind: input, shape index: {}]   ;;  %s1342_s4 = inlined_call_operand.vmem [shape: f32[1,128], index: 4, kind: input, shape index: {}]   ;;  %s1343_s5 = inlined_call_operand.hbm [shape: bf16[128,128], index: 5, kind: input, shape index: {}]   ;;  %s1344_s6 = inlined_call_operand.vmem [shape: f32[1,128], index: 6, kind: input, shape index: {}]   ;;  %s1345_s7 = inlined_call_operand.hbm [shape: f32[32,128], index: 7, kind: output, shape index: {}]  }
   0x1   :  { %1348 = sst [smem:[#allocation15_spill]] %s1339_s1 }
   0x2   :  { %12 = vsyncpa [#allocation3], 0 }
   0x3   :  { %14 = vsyncpa [#allocation3 + $0x1], 0 }
   0x4   :  { %15 = vsyncpa [#allocation6], 0 }
   0x5   :  { %16 = vsyncpa [#allocation9], 0 }
   0x6   :  { %17 = vsyncpa [#allocation4], 0 }
   0x7   :  { %19 = vsyncpa [#allocation4 + $0x1], 0  ;;  %s1158_s24 = smov 0   ;;  %s1160_s25 = smov 0  }
   0x8   :  { %s1162_s26 = smov 0   ;;  %s1164_s27 = smov 0  }
   0x9 LB: > { %s1179_s28 = sadd.s32 4294967295, %s1109_s27   ;;  %s703_s29 = sadd.s32 4294967294, %s1109_s27   ;;  %s1109_s27 = sphi %s1164_s27, %s1362_s27   ;;  %s1105_s26 = sphi %s1162_s26, %s1361_s26   ;;  %s1101_s25 = sphi %s1160_s25, %s1360_s25   ;;  %s1097_s24 = sphi %s1158_s24, %s1359_s24  }
   0xa   : > { %p45_p0 = scmp.ne.s32.totalorder %s1101_s25, %s1097_s24  ;;  %p46_p1 = scmp.eq.s32.totalorder %s1179_s28, 0 }
   0xb   : > { %p195_p2 = scmp.eq.s32.totalorder %s1179_s28, 1  ;;  %p201_p3 = scmp.eq.s32.totalorder %s703_s29, 1 }
   0xc   : > { %p1188_p4 = por %p46_p1, %p45_p0  ;;  %p704_p5 = scmp.ge.s32.totalorder %s1109_s27, 1 }
   0xd   : > { %p1193_p6 = por %p201_p3, %p45_p0  ;;  %p208_p7 = scmp.lt.s32.totalorder %s1109_s27, 3 }
   0xe   : > { %s1351_s1 = sld [smem:[#allocation15_spill]]  ;;  %s1111_s13 = smov [#allocation5]  }
   0xf   : > { %p1201_p8 = pnand %p704_p5, %p208_p7  ;;  %s221_s14 = sshll.u32 %s1111_s13, 4  ;;  %s222_s14 = int_to_ptr.vmem [resolvable:$true] %s221_s14 }
  0x10   : > { %s236_s18 = sshll.u32 %s1341_s3, 4  ;;  %s1346_s19 = smov 64   ;;  %s237_s18 = int_to_ptr.hbm [resolvable:$true] %s236_s18 }
  0x11   : > { %p847_p9 = pneg %p1201_p8  ;;  %s1347_s20 = smov 4  }
  0x12   : > { %s1114_s21 = smov [#allocation7]   ;;  %s253_s9 = sshll.u32 %s1343_s5, 4  ;;  %s254_s9 = int_to_ptr.hbm [resolvable:$true] %s253_s9 }
  0x13   : > { %p1209_p10 = pnand %p847_p9, %p46_p1  ;;  %s238_s22 = sshll.u32 %s1114_s21, 4  ;;  %s239_s22 = int_to_ptr.vmem [resolvable:$true] %s238_s22 }
  0x14   : > { %s219_s11 = sshll.u32 %s1351_s1, 4  ;;  %s1115_s10 = smov [#allocation8]   ;;  %s220_s11 = int_to_ptr.hbm [resolvable:$true] %s219_s11 }
  0x15   : > { %850 = dma.hbm_to_vmem [thread:$0]  (!%p1209_p10), %s220_s11, 512, %s222_s14, [#allocation6], %s1346_s19, %s1346_s19, %s1347_s20  }
  0x16   : > { %853 = dma.hbm_to_vmem [thread:$0]  (!%p1209_p10), %s237_s18, 1024, %s239_s22, [#allocation6], %s1346_s19, %s1346_s19, %s1347_s20  }
  0x17   : > { %s255_s11 = sshll.u32 %s1115_s10, 4  ;;  %s1231_s13 = sadd.s32 1, %s1109_s27   ;;  %s256_s11 = int_to_ptr.vmem [resolvable:$true] %s255_s11 }
  0x18   : > { %856 = dma.hbm_to_vmem [thread:$0]  (!%p1209_p10), %s254_s9, 1024, %s256_s11, [#allocation9], %s1346_s19, %s1346_s19, %s1347_s20  }
  0x19   : > { %s29_s14 = ssub.s32 %s1109_s27, %s1231_s13  ;;  %s32_s16 = sadd.s32 1, %s1105_s26 }
  0x1a   : > { %p30_p12 = scmp.eq.s32.totalorder %s29_s14, 0  ;;  %p39_p13 = scmp.ne.s32.totalorder %s1105_s26, %s1101_s25 }
  0x1b   : > { %p40_p0 = scmp.eq.s32.totalorder %s1109_s27, 0  ;;  %p868_p5 = scmp.lt.s32.totalorder %s1109_s27, 2 }
  0x1c   : > { %s1245_s17 = scalar_select %p30_p12, %s1105_s26, %s32_s16  }
  0x1d   : > { %p1249_p3 = por %p195_p2, %p39_p13  ;;  %s272_s21 = sand.u32 1, %s1105_s26  }
  0x1e   : > { %s808_s15 = sshll.u32 %s1109_s27, 3  ;;  %p41_p7 = por %p40_p0, %p39_p13 }
  0x1f   : > { %s709_s22 = sshll.u32 %s272_s21, 3  ;;  %s281_s9 = scalar_lea.hbm %s1338_s0, %s808_s15 }
  0x20   : > { %s282_s10 = sshll.u32 %s281_s9, 4  ;;  %s276_s11 = scalar_lea.vmem [#allocation2], %s709_s22  ;;  %s283_s10 = int_to_ptr.hbm [resolvable:$true] %s282_s10 }
  0x21   : > { %s284_s14 = sshll.u32 %s276_s11, 4  ;;  %p1259_p9 = pnand %p868_p5, %p41_p7  ;;  %s285_s14 = int_to_ptr.vmem [resolvable:$true] %s284_s14 }
  0x22   : > { %s273_s19 = scalar_lea.sflag [#allocation3], %s272_s21  ;;  %s1005_s20 = sshra.s32 %s283_s10, 4  ;;  %s1006_s20 = int_to_ptr.hbm [resolvable:$true] %s1005_s20 }
  0x23   : > { %s1007_s1 = scalar_lea.hbm %s1006_s20, 8  ;;  %p1009_p10 = pneg %p1259_p9 }
  0x24   : > { %p1008_p2 = scmp.ne.s32.totalorder %s1006_s20, %s1007_s1  ;;  %s1012_s22 = scalar_lea.hbm %s1338_s0, 16 }
  0x25   : > { %p1013_p0 = scmp.lt.s32.totalorder %s1006_s20, %s1338_s0  ;;  %p1014_p5 = scmp.lt.s32.totalorder %s1012_s22, %s1007_s1 }
  0x26   : > { %p1010_p12 = pnand %p1009_p10, %p1008_p2 }
  0x27   : > { %p1015_p7 = por %p1014_p5, %p1013_p0 }
  0x28   : > { %p1011_p13 = pneg %p1010_p12 }
  0x2a   : > { %p1016_p11 = pnand %p1015_p7, %p1011_p13 }
  0x2c   : > { %1019 = shalt.err (!%p1016_p11)
}
  0x2d   : > { %s1356_s21 = smov 4   ;;  %s1357_s11 = smov 64  }
  0x2e   : > { %860 = dma.hbm_to_vmem [thread:$0]  (!%p1259_p9), %s283_s10, 128, %s285_s14, %s273_s19, %s1357_s11, %s1357_s11, %s1356_s21  }
  0x2f   : > { %296 = sbr.rel (%p1201_p8) target bundleno = 499 (0x1f3), region = 48  ;;  %s1279_s15 = sand.u32 (!%p1201_p8), 1, %s1101_s25  }
  0x30   : > { %s713_s20 = sshll.u32 (!%p1201_p8), %s1279_s15, 3  ;;  %s299_s1 = scalar_lea.sflag (!%p1201_p8), [#allocation3], %s1279_s15 }
  0x31   : > { %s302_s23 = scalar_lea.vmem (!%p1201_p8), [#allocation2], %s713_s20 }
  0x34   : > { %1080 = dma.done.wait (%p1188_p4), %s299_s1, 128  }
  0x35   : > { %1082 = vsyncadd (%p1188_p4), %s299_s1, 4294967168 }
  0x36   : > { %1084 = dma.done.wait (%p46_p1), [#allocation6], 1536  }
  0x37   : > { %1086 = vsyncadd (%p46_p1), [#allocation6], 4294965760 }
  0x38   : > { %1088 = dma.done.wait (%p46_p1), [#allocation9], 1024  }
  0x39   : > { %1090 = vsyncadd (%p46_p1), [#allocation9], 4294966272  ;;  %v813_v0 = vld [vmem:[#allocation5 + $0x18] sm:$0xff]  ;;  %v812_v2 = vld [vmem:[#allocation5 + $0x10] sm:$0xff]  ;;  %vm395_vm0 = vcmask 523264   ;;  %s717_s14 = sshll.u32 %s1279_s15, 4 }
  0x3a   : > { %v821_v1 = vld [vmem:[#allocation7 + $0x38] sm:$0xff]  ;;  %403 = vmatpush.bf16.msra.mxu0 %v813_v0  ;;  %v820_v3 = vld [vmem:[#allocation7 + $0x30] sm:$0xff]  ;;  %v811_v4 = vld [vmem:[#allocation5 + $0x8] sm:$0xff]  ;;  %s830_s29 = sshll.u32 %s1179_s28, 4  ;;  %s348_s20 = scalar_lea.vmem [#allocation10], %s717_s14 }
  0x3b   : > { %484 = vmatpush.bf16.msra.mxu1 %v821_v1  ;;  %v819_v5 = vld [vmem:[#allocation7 + $0x28] sm:$0xff]  ;;  %v810_v6 = vld [vmem:[#allocation5] sm:$0xff]  ;;  %v809_v8 = vld [vmem:[%s302_s23] sm:$0xff]  ;;  %s597_s11 = scalar_lea.hbm %s1345_s7, %s830_s29  ;;  %s598_s1 = sshll.u32 %s348_s20, 4  ;;  %s599_s1 = int_to_ptr.vmem [resolvable:$true] %s598_s1 }
  0x3c   : > { %v818_v7 = vld [vmem:[#allocation7 + $0x20] sm:$0xff]  ;;  %v817_v9 = vld [vmem:[#allocation7 + $0x18] sm:$0xff]  ;;  %v816_v10 = vld [vmem:[#allocation7 + $0x10] sm:$0xff]  ;;  %s600_s23 = sshll.u32 %s597_s11, 4  ;;  %s586_s30 = scalar_lea.sflag [#allocation4], %s1279_s15  ;;  %s601_s23 = int_to_ptr.hbm [resolvable:$true] %s600_s23 }
  0x3d   : > { %v815_v11 = vld [vmem:[#allocation7 + $0x8] sm:$0xff]  ;;  %v814_v12 = vld [vmem:[#allocation7] sm:$0xff]  ;;  %v829_v13 = vld [vmem:[#allocation8 + $0x38] sm:$0xff]  ;;  %s1049_s12 = sshra.s32 %s601_s23, 4  ;;  %s1055_s14 = scalar_lea.hbm %s1345_s7, 32  ;;  %s1050_s12 = int_to_ptr.hbm [resolvable:$true] %s1049_s12 }
  0x3e   : > { %404 = vmatpush.bf16.msra.mxu0 %v812_v2  ;;  %569 = vmatpush.bf16.msra.mxu2 %v829_v13  ;;  %v828_v14 = vld [vmem:[#allocation8 + $0x30] sm:$0xff]  ;;  %v827_v15 = vld [vmem:[#allocation8 + $0x28] sm:$0xff]  ;;  %v826_v16 = vld [vmem:[#allocation8 + $0x20] sm:$0xff]  ;;  %s1051_s28 = scalar_lea.hbm %s1050_s12, 16  ;;  %p1056_p11 = scmp.lt.s32.totalorder %s1050_s12, %s1345_s7 }
  0x3f   : > { %485 = vmatpush.bf16.msra.mxu1 %v820_v3  ;;  %v912_v18 = vld [vmem:[%s1340_s2] ss:$0 sm:$0xff]  ;;  %v825_v25 = vld [vmem:[#allocation8 + $0x18] sm:$0xff]  ;;  %v823_v27 = vld [vmem:[#allocation8 + $0x8] sm:$0xff]  ;;  %p1052_p1 = scmp.ne.s32.totalorder %s1050_s12, %s1051_s28  ;;  %p1057_p9 = scmp.lt.s32.totalorder %s1055_s14, %s1051_s28 }
  0x40   : > { %v824_v26 = vld [vmem:[#allocation8 + $0x10] sm:$0xff]  ;;  %v822_v28 = vld [vmem:[#allocation8] sm:$0xff] }
  0x41   : > { %v913_v30 = vld [vmem:[%s1342_s4] ss:$0 sm:$0xff]  ;;  %p1053_p4 = pnand %p1052_p1, %p1249_p3  ;;  %p1058_p2 = por %p1057_p9, %p1056_p11 }
  0x42   : > { %405 = vmatpush.bf16.msra.mxu0 %v811_v4  ;;  %570 = vmatpush.bf16.msra.mxu2 %v828_v14  ;;  %v914_v37 = vld [vmem:[%s1344_s6] ss:$0 sm:$0xff] }
  0x43   : > { %486 = vmatpush.bf16.msra.mxu1 %v819_v5  ;;  %p1054_p8 = pneg %p1053_p4 }
  0x45   : > { %p1059_p10 = pnand %p1058_p2, %p1054_p8 }
  0x46   : > { %406 = vmatpush.bf16.msra.mxu0 %v810_v6  ;;  %571 = vmatpush.bf16.msra.mxu2 %v827_v15 }
  0x47   : > { %487 = vmatpush.bf16.msra.mxu1 %v818_v7 }
  0x49   : > { %738 = vmatmul.msk.bf16.vlgmr.msra.gmra.mxu0 %vm395_vm0, %v809_v8 }
  0x4a   : > { %572 = vmatpush.bf16.msra.mxu2 %v826_v16 }
  0x4b   : > { %488 = vmatpush.bf16.msra.mxu1 %v817_v9 }
  0x4e   : > { %573 = vmatpush.bf16.msra.mxu2 %v825_v25 }
  0x4f   : > { %489 = vmatpush.bf16.msra.mxu1 %v816_v10 }
  0x52   : > { %574 = vmatpush.bf16.msra.mxu2 %v824_v26 }
  0x53   : > { %490 = vmatpush.bf16.msra.mxu1 %v815_v11 }
  0x56   : > { %575 = vmatpush.bf16.msra.mxu2 %v823_v27 }
  0x57   : > { %491 = vmatpush.bf16.msra.mxu1 %v814_v12 }
  0x5a   : > { %576 = vmatpush.bf16.msra.mxu2 %v822_v28 }
  0xc6   : > { %v408_v17 = vpop.f32.mrf.mxu0 }
  0xc7   : > { %v409_v19 = vadd.f32 %v912_v18, %v408_v17 }
  0xc9   : > { %v413_v22 = vmax.f32 %v409_v19, 0.0 }
  0xce   : > { %v410_v20 = vpop.f32.mrf.mxu0 }
  0xcf   : > { %v411_v21 = vadd.f32 %v912_v18, %v410_v20 }
  0xd1   : > { %v414_v23 = vmax.f32 %v411_v21, 0.0 }
  0xd3   : > { %v415_v24 = vpack.c.bf16 %v414_v23, %v413_v22 }
  0xd5   : > { %492 = vmatmul.bf16.vlgmr.msra.gmra.mxu1 %v415_v24 }
 0x152   : > { %v493_v29 = vpop.f32.mrf.mxu1 }
 0x153   : > { %v494_v31 = vadd.f32 %v913_v30, %v493_v29 }
 0x155   : > { %v498_v34 = vmax.f32 %v494_v31, 0.0 }
 0x15a   : > { %v495_v32 = vpop.f32.mrf.mxu1 }
 0x15b   : > { %v496_v33 = vadd.f32 %v913_v30, %v495_v32 }
 0x15d   : > { %v499_v35 = vmax.f32 %v496_v33, 0.0 }
 0x15f   : > { %v500_v36 = vpack.c.bf16 %v499_v35, %v498_v34 }
 0x161   : > { %577 = vmatmul.bf16.vlgmr.msra.gmra.mxu2 %v500_v36 }
 0x1e4   : > { %v578_v38 = vpop.f32.mrf.mxu2 }
 0x1e5   : > { %v579_v39 = vadd.f32 %v914_v37, %v578_v38 }
 0x1e7   : > { %583 = vst [vmem:[%s348_s20] sm:$0xff] %v579_v39 }
 0x1ec   : > { %v580_v40 = vpop.f32.mrf.mxu2 }
 0x1ed   : > { %v581_v41 = vadd.f32 %v914_v37, %v580_v40 }
 0x1ef   : > { %584 = vst [vmem:[%s348_s20 + $0x8] sm:$0xff] %v581_v41 }
 0x1f0   : > { %1062 = shalt.err (!%p1059_p10)
}
 0x1f1   : > { %s1116_s15 = smov 128   ;;  %s1117_s29 = smov 8  }
 0x1f2   : > { %845 = dma.vmem_to_hbm [thread:$0]  (%p1249_p3), %s599_s1, 256, %s601_s23, %s586_s30, %s1116_s15, %s1116_s15, %s1117_s29  }
 0x1f3 PF: > { %s615_s9 = sand.u32 1, %s1097_s24   ;;  %p1358_p12 = scmp.ge.s32.totalorder %s1109_s27, 2 }
 0x1f4   : > { %s616_s21 = scalar_lea.sflag [#allocation4], %s615_s9 }
 0x1f5   : > { %p862_p13 = pnand %p1358_p12, %p1193_p6 }
 0x1f7   : > { %p863_p0 = pneg %p862_p13 }
 0x1f9   : > { %1092 = dma.done.wait (%p863_p0), %s616_s21, 256  }
 0x1fa   : > { %1094 = vsyncadd (%p863_p0), %s616_s21, 4294967040  ;;  %p22_p5 = scmp.ge.s32.totalorder %s1231_s13, 4   ;;  %s1359_s24 = smov %s1101_s25 }
 0x1fb   : > { %s1360_s25 = smov %s1105_s26  ;;  %s1361_s26 = smov %s1245_s17 }
 0x1fc   : > { %s1362_s27 = smov %s1231_s13  ;;  %24 = sbr.rel (!%p22_p5) target bundleno = 9 (0x9), region = 105 }
 0x201   :  { %622 = vsyncpa [#allocation3], 1 }
 0x202   :  { %624 = vsyncpa [#allocation3 + $0x1], 1 }
 0x203   :  { %625 = vsyncpa [#allocation6], 1 }
 0x204   :  { %626 = vsyncpa [#allocation9], 1 }
 0x205   :  { %627 = vsyncpa [#allocation4], 1 }
 0x206   :  { %629 = vsyncpa [#allocation4 + $0x1], 1 }

</bundles_post_ra>
